<compile_context>
chip_gen: v7x
topology: tpu7x:2x2x1
jax: 0.10.0
libtpu: 0.0.40
codegen_flags: <defaults>
</compile_context>

<pallas_src>
import functools
import math

import numpy as np

import jax
import jax.numpy as jnp
from jax.experimental import pallas as pl
from jax.experimental.pallas import tpu as pltpu

NUM_EMBEDDINGS = 16            # num_embeddings (must be even, as in the module)


def _pos_enc_kernel(eidx_ref, sel_hi_ref, sel_lo_ref, fp_ref, out_ref):
    """One (batch, N-tile) block.

    eidx_ref   : (1, TN, K)   int32  neighbor indices
    sel_hi_ref : (K, K*E)     f32    sel_hi[j, j*E + s] = 256.0 (hi-byte expansion)
    sel_lo_ref : (K, K*E)     f32    sel_lo[j, j*E + s] = 1.0   (lo-byte expansion)
    fp_ref     : (2, K*E)     f32    row0 = freq tiled per neighbor,
                                     row1 = phase (0 for cos half, pi/2 for sin half)
    out_ref    : (1, TN, K*E) f32    lane-dense output tile
    """
    tn = eidx_ref.shape[1]
    e = eidx_ref[0]                                              # (TN, K) int32

    # Relative offset d = E_idx - n on the narrow int32 path (16x fewer lanes
    # than the dense output), including the global row offset of this N-tile.
    row = (jax.lax.broadcasted_iota(jnp.int32, e.shape, 0)
           + pl.program_id(1) * tn)
    d = e - row                                                  # (TN, K) int32

    # Exact two's-complement hi/lo byte split: d == 256*(d>>8) + (d & 0xFF).
    # Both halves are bf16-exact integers (|hi| <= 256, 0 <= lo <= 255), so the
    # MXU expansion below is exact even if the MXU rounds f32 inputs to bf16.
    d_hi = (d >> 8).astype(jnp.float32)
    d_lo = (d & 0xFF).astype(jnp.float32)

    # Expand each neighbor offset across its E embedding lanes on the MXU.
    # The 256 scale lives in sel_hi, so only one dense VPU add remains here.
    d16 = (jnp.dot(d_hi, sel_hi_ref[...], preferred_element_type=jnp.float32)
           + jnp.dot(d_lo, sel_lo_ref[...], preferred_element_type=jnp.float32))

    # Lane-dense (TN, K*E): one mul + one sub (VPU) + one cos (EUP) per element.
    # cos half and sin half (= cos(x - pi/2)) in a single EUP pass.
    out_ref[0] = jnp.cos(d16 * fp_ref[0:1, :] - fp_ref[1:2, :])


@functools.lru_cache(maxsize=None)
def _constants(K: int, E: int):
    """Host-side constants for a given (top_k, num_embeddings); cached per shape."""
    H = E // 2
    L = K * E
    freq = np.exp(np.arange(H, dtype=np.float64)
                  * (-2.0 * math.log(10000.0) / E)).astype(np.float32)     # (H,)
    freq_e = np.concatenate([freq, freq])                                  # (E,)
    phase_e = np.concatenate([np.zeros(H, np.float32),
                              np.full(H, np.pi / 2.0, dtype=np.float32)])  # (E,)
    fp = np.stack([np.tile(freq_e, K),
                   np.tile(phase_e, K)]).astype(np.float32)                # (2, L)

    rows = np.arange(K)[:, None]
    cols = rows * E + np.arange(E)[None, :]                                # (K, E)
    sel_hi = np.zeros((K, L), np.float32)
    sel_hi[rows, cols] = 256.0
    sel_lo = np.zeros((K, L), np.float32)
    sel_lo[rows, cols] = 1.0
    return jnp.asarray(sel_hi), jnp.asarray(sel_lo), jnp.asarray(fp)


def _choose_tile_n(B: int, N: int, K: int, E: int) -> int:
    """Largest N-tile that fits the per-step VMEM budget; split for megacore."""
    def rup(x, m):
        return -(-x // m) * m

    L = K * E
    # Double-buffered input + output VMEM per row (last dim lane-pads to 128).
    per_row_bytes = (rup(K, 128) + rup(L, 128)) * 4 * 2
    budget = 12 * 1024 * 1024      # under v5e's 16 MiB default scoped VMEM limit
    cap = min(8192, max(8, (budget // per_row_bytes) // 8 * 8))

    tile_n = N if N <= cap else cap

    # With B == 1 make sure the grid has >= 2 "parallel" steps so both v7x
    # TensorCores (sharing the HBM store bandwidth) get work.
    if B == 1 and N >= 64:
        target_steps = 4 if N >= 4096 else 2
        tile_n = min(tile_n, rup(pl.cdiv(N, target_steps), 8))
    return tile_n


@functools.partial(jax.jit, static_argnames=("num_embeddings",))
def positional_encodings(E_idx: jax.Array,
                         num_embeddings: int = NUM_EMBEDDINGS) -> jax.Array:
    """Pallas implementation of PositionalEncodings.forward (af2_relpos=False).

    E_idx: (B, N, K) integer array of neighbor indices.
    Returns: (B, N, K, num_embeddings) float32.
    """
    B, N, K = E_idx.shape
    E = num_embeddings
    assert E % 2 == 0, "num_embeddings must be even"
    # Exactness of the hi/lo MXU expansion requires |E_idx - n| < 65536.
    assert N < 65536, "sequence length must be < 65536 for exact index expansion"
    L = K * E

    sel_hi, sel_lo, fp = _constants(K, E)
    tile_n = _choose_tile_n(B, N, K, E)
    grid = (B, pl.cdiv(N, tile_n))

    out_flat = pl.pallas_call(
        _pos_enc_kernel,
        out_shape=jax.ShapeDtypeStruct((B, N, L), jnp.float32),
        grid=grid,
        in_specs=[
            pl.BlockSpec((1, tile_n, K), lambda b, n: (b, n, 0)),
            pl.BlockSpec((K, L), lambda b, n: (0, 0)),
            pl.BlockSpec((K, L), lambda b, n: (0, 0)),
            pl.BlockSpec((2, L), lambda b, n: (0, 0)),
        ],
        out_specs=pl.BlockSpec((1, tile_n, L), lambda b, n: (b, n, 0)),
        compiler_params=pltpu.CompilerParams(
            dimension_semantics=("parallel", "parallel")),
    )(E_idx.astype(jnp.int32), sel_hi, sel_lo, fp)

    # Free reshape: HBM layout of (B, N, K*E) and (B, N, K, E) is identical.
    return out_flat.reshape(B, N, K, E)


def _reference(E_idx: jax.Array, num_embeddings: int = NUM_EMBEDDINGS) -> jax.Array:
    """Pure-JAX port of PositionalEncodings._transformer_encoding."""
    _, N, _ = E_idx.shape
    ii = jnp.arange(N, dtype=jnp.float32).reshape(1, -1, 1)
    d = (E_idx.astype(jnp.float32) - ii)[..., None]
    freq = jnp.exp(
        jnp.arange(0, num_embeddings, 2, dtype=jnp.float32)
        * -(math.log(10000.0) / num_embeddings)
    )
    angles = d * freq.reshape(1, 1, 1, -1)
    return jnp.concatenate([jnp.cos(angles), jnp.sin(angles)], axis=-1)


if __name__ == "__main__":
    key = jax.random.PRNGKey(0)
    B, N, K = 2, 8, 8
    # Neighbor indices in [0, N), like k-NN indices over residues.
    E_idx = jax.random.randint(key, (B, N, K), 0, N, dtype=jnp.int32)

    out = positional_encodings(E_idx)
    out = jax.block_until_ready(out)

    ref = _reference(E_idx)
    assert out.shape == (B, N, K, NUM_EMBEDDINGS), out.shape
    assert out.dtype == jnp.float32
    # Note: sin is emitted as cos(x - pi/2); abs error grows ~|d|*1e-7 for very
    # long chains — at this test size it is far below the tolerance.
    assert jnp.allclose(out, ref, atol=2e-5, rtol=2e-5), (
        float(jnp.max(jnp.abs(out - ref)))
    )
    print("KERNEL_OK")
</pallas_src>

<mosaic_0001>
module attributes {stable_mosaic.version = 11 : i64} {
  func.func @_pos_enc_kernel(%arg0: i32, %arg1: i32, %arg2: memref<1x8x8xi32, #tpu.memory_space<vmem>>, %arg3: memref<8x128xf32, #tpu.memory_space<vmem>>, %arg4: memref<8x128xf32, #tpu.memory_space<vmem>>, %arg5: memref<2x128xf32, #tpu.memory_space<vmem>>, %arg6: memref<1x8x128xf32, #tpu.memory_space<vmem>>) attributes {dimension_semantics = [#tpu.dimension_semantics<parallel>, #tpu.dimension_semantics<parallel>], iteration_bounds = array<i64: 2, 1>, scalar_prefetch = 0 : i64, scratch_operands = 0 : i64, tpu.core_type = #tpu.core_type<tc>, window_params = [{transform_indices = @transform_0, window_bounds = array<i64: 1, 8, 8>}, {pipeline_mode = #tpu.pipeline_mode<synchronous>, transform_indices = @transform_1, window_bounds = array<i64: 8, 128>}, {pipeline_mode = #tpu.pipeline_mode<synchronous>, transform_indices = @transform_2, window_bounds = array<i64: 8, 128>}, {pipeline_mode = #tpu.pipeline_mode<synchronous>, transform_indices = @transform_3, window_bounds = array<i64: 2, 128>}, {transform_indices = @transform_4, window_bounds = array<i64: 1, 8, 128>}]} {
    %c0 = arith.constant 0 : index
    %c0_0 = arith.constant 0 : index
    %c0_1 = arith.constant 0 : index
    %0 = vector.load %arg2[%c0, %c0_0, %c0_1] : memref<1x8x8xi32, #tpu.memory_space<vmem>>, vector<1x8x8xi32>
    %1 = vector.shape_cast %0 : vector<1x8x8xi32> to vector<8x8xi32>
    %2 = tpu.iota {dimensions = array<i32: 0>} : vector<8x8xi32>
    %c8_i32 = arith.constant 8 : i32
    %3 = arith.muli %arg1, %c8_i32 : i32
    %4 = vector.broadcast %3 : i32 to vector<8x8xi32>
    %5 = arith.addi %2, %4 : vector<8x8xi32>
    %6 = arith.subi %1, %5 : vector<8x8xi32>
    %c8_i32_2 = arith.constant 8 : i32
    %7 = vector.broadcast %c8_i32_2 : i32 to vector<8x8xi32>
    %8 = arith.shrsi %6, %7 : vector<8x8xi32>
    %9 = arith.sitofp %8 : vector<8x8xi32> to vector<8x8xf32>
    %c255_i32 = arith.constant 255 : i32
    %10 = vector.broadcast %c255_i32 : i32 to vector<8x8xi32>
    %11 = arith.andi %6, %10 : vector<8x8xi32>
    %12 = arith.sitofp %11 : vector<8x8xi32> to vector<8x8xf32>
    %c0_3 = arith.constant 0 : index
    %c0_4 = arith.constant 0 : index
    %13 = vector.load %arg3[%c0_3, %c0_4] : memref<8x128xf32, #tpu.memory_space<vmem>>, vector<8x128xf32>
    %cst = arith.constant dense<0.000000e+00> : vector<8x128xf32>
    %14 = tpu.matmul %9, %13, %cst {dimension_numbers = #tpu.dot_dimension_numbers<[1], [0], [0], [1], [0, 0, 1, 1], [], []>} : vector<8x8xf32>, vector<8x128xf32>, vector<8x128xf32> -> vector<8x128xf32>
    %c0_5 = arith.constant 0 : index
    %c0_6 = arith.constant 0 : index
    %15 = vector.load %arg4[%c0_5, %c0_6] : memref<8x128xf32, #tpu.memory_space<vmem>>, vector<8x128xf32>
    %cst_7 = arith.constant dense<0.000000e+00> : vector<8x128xf32>
    %16 = tpu.matmul %12, %15, %cst_7 {dimension_numbers = #tpu.dot_dimension_numbers<[1], [0], [0], [1], [0, 0, 1, 1], [], []>} : vector<8x8xf32>, vector<8x128xf32>, vector<8x128xf32> -> vector<8x128xf32>
    %17 = arith.addf %14, %16 : vector<8x128xf32>
    %c0_8 = arith.constant 0 : index
    %c0_9 = arith.constant 0 : index
    %18 = vector.load %arg5[%c0_8, %c0_9] : memref<2x128xf32, #tpu.memory_space<vmem>>, vector<1x128xf32>
    %19 = vector.broadcast %18 : vector<1x128xf32> to vector<8x128xf32>
    %20 = arith.mulf %17, %19 : vector<8x128xf32>
    %c1 = arith.constant 1 : index
    %c0_10 = arith.constant 0 : index
    %21 = vector.load %arg5[%c1, %c0_10] : memref<2x128xf32, #tpu.memory_space<vmem>>, vector<1x128xf32>
    %22 = vector.broadcast %21 : vector<1x128xf32> to vector<8x128xf32>
    %23 = arith.subf %20, %22 : vector<8x128xf32>
    %24 = math.cos %23 : vector<8x128xf32>
    %c0_11 = arith.constant 0 : index
    %c0_12 = arith.constant 0 : index
    %c0_13 = arith.constant 0 : index
    %25 = vector.load %arg6[%c0_11, %c0_12, %c0_13] : memref<1x8x128xf32, #tpu.memory_space<vmem>>, vector<1x8x128xf32>
    %26 = vector.shape_cast %25 : vector<1x8x128xf32> to vector<8x128xf32>
    %27 = vector.shape_cast %24 : vector<8x128xf32> to vector<1x8x128xf32>
    tpu.vector_store %arg6[%c0_11, %c0_12, %c0_13], %27 {strides = array<i32>} : memref<1x8x128xf32, #tpu.memory_space<vmem>>, vector<1x8x128xf32>,
    return
  }
  func.func @transform_0(%arg0: i32, %arg1: i32) -> (i32, i32, i32) {
    %c0_i32 = arith.constant 0 : i32
    %c0_i32_0 = arith.constant 0 : i32
    return %arg0, %arg1, %c0_i32 : i32, i32, i32
  }
  func.func @transform_1(%arg0: i32, %arg1: i32) -> (i32, i32) {
    %c0_i32 = arith.constant 0 : i32
    %c0_i32_0 = arith.constant 0 : i32
    %c0_i32_1 = arith.constant 0 : i32
    return %c0_i32, %c0_i32_0 : i32, i32
  }
  func.func @transform_2(%arg0: i32, %arg1: i32) -> (i32, i32) {
    %c0_i32 = arith.constant 0 : i32
    %c0_i32_0 = arith.constant 0 : i32
    %c0_i32_1 = arith.constant 0 : i32
    return %c0_i32, %c0_i32_0 : i32, i32
  }
  func.func @transform_3(%arg0: i32, %arg1: i32) -> (i32, i32) {
    %c0_i32 = arith.constant 0 : i32
    %c0_i32_0 = arith.constant 0 : i32
    %c0_i32_1 = arith.constant 0 : i32
    return %c0_i32, %c0_i32_0 : i32, i32
  }
  func.func @transform_4(%arg0: i32, %arg1: i32) -> (i32, i32, i32) {
    %c0_i32 = arith.constant 0 : i32
    %c0_i32_0 = arith.constant 0 : i32
    return %arg0, %arg1, %c0_i32 : i32, i32, i32
  }
}

</mosaic_0001>

<bundles_post_ra>
// kernel: positional_encodings.1
= control target key start
LH: loop header
LB: loop body
LE: loop exit
PB: predicated region body
PF: predicated region fallthrough
CT: control target
= control target key end

     0   :  { %9 = vsyncpa [#allocation3], 0  ;;  %s1165_s0 = inlined_call_operand.hbm [shape: s32[2,8,8], index: 0, kind: input, shape index: {}]   ;;  %s1166_s1 = inlined_call_operand.hbm [shape: f32[8,128], index: 1, kind: input, shape index: {}]   ;;  %s1167_s2 = inlined_call_operand.hbm [shape: f32[8,128], index: 2, kind: input, shape index: {}]   ;;  %s1168_s3 = inlined_call_operand.vmem [shape: f32[2,128], index: 3, kind: input, shape index: {}]   ;;  %s1169_s4 = inlined_call_operand.vmem [shape: f32[2,8,128], index: 4, kind: output, shape index: {}]  }
   0x1   :  { %11 = vsyncpa [#allocation3 + $0x1], 0 }
   0x2   :  { %12 = vsyncpa [#allocation5], 0  ;;  %s948_s15 = smov 0   ;;  %s950_s16 = smov 0  }
   0x3   :  { %s952_s17 = smov 0   ;;  %s954_s18 = smov 0  }
   0x4   :  { %s956_s19 = smov 0   ;;  %s958_s20 = smov 0  }
   0x5 LB: > { %s640_s21 = sadd.s32 4294967295, %s910_s20   ;;  %p52_p0 = scmp.ne.s32.totalorder %s894_s16, %s890_s15  ;;  %s910_s20 = sphi %s958_s20, %s18_s20   ;;  %s906_s19 = sphi %s956_s19, %s1186_s19   ;;  %s902_s18 = sphi %s954_s18, %s1185_s18   ;;  %s898_s17 = sphi %s952_s17, %s1184_s17   ;;  %s894_s16 = sphi %s950_s16, %s1183_s16   ;;  %s890_s15 = sphi %s948_s15, %s1182_s15  }
   0x6   : > { %p978_p1 = scmp.eq.s32.totalorder %s640_s21, 0  ;;  %p642_p2 = scmp.ge.s32.totalorder %s910_s20, 1 }
   0x7   : > { %p154_p3 = scmp.lt.s32.totalorder %s910_s20, 3  ;;  %s912_s25 = smov [#allocation4]  }
   0x8   : > { %s1174_s22 = scalar_select %p978_p1, 1, 0 }
   0x9   : > { %p986_p4 = por %p978_p1, %p52_p0  ;;  %p990_p5 = pnand %p642_p2, %p154_p3 }
   0xa   : > { %s167_s26 = sshll.u32 %s912_s25, 4  ;;  %s913_s27 = smov [#allocation6]   ;;  %s168_s26 = int_to_ptr.vmem [resolvable:$true] %s167_s26 }
   0xb   : > { %s1175_s23 = scalar_select %p986_p4, 1, 0 }
   0xc   : > { %s1176_s24 = scalar_select %p990_p5, 1, 0 }
   0xd   : > { %p692_p6 = pneg %p990_p5  ;;  %s178_s28 = sshll.u32 %s913_s27, 4  ;;  %s1002_s28 = int_to_ptr.vmem [resolvable:$true] %s178_s28 }
   0xe   : > { %s770_s6 = scalar_lea.hbm %s1166_s1, 128 }
   0xf   : > { %p998_p7 = pnand %p692_p6, %p978_p1  ;;  %p771_p8 = scmp.ne.s32.totalorder %s1166_s1, %s770_s6 }
  0x10   : > { %p777_p12 = scmp.lt.u32.totalorder %s770_s6, %s1166_s1 }
  0x11   : > { %p772_p9 = pneg %p998_p7 }
  0x13   : > { %p773_p10 = pnand %p772_p9, %p771_p8 }
  0x15   : > { %p774_p11 = pneg %p773_p10 }
  0x17   : > { %p779_p13 = pnand %p777_p12, %p774_p11 }
  0x19   : > { %782 = shalt.err (!%p779_p13)
}
  0x1a   : > { %s783_s11 = scalar_lea.vmem %s168_s26, 128  ;;  %p791_p6 = scmp.lt.s32.totalorder %s168_s26, %s168_s26 }
  0x1b   : > { %p784_p0 = scmp.ne.s32.totalorder %s168_s26, %s783_s11  ;;  %p792_p1 = scmp.lt.s32.totalorder %s783_s11, %s783_s11 }
  0x1d   : > { %p786_p2 = pnand %p784_p0, %p772_p9  ;;  %p793_p4 = por %p792_p1, %p791_p6 }
  0x1f   : > { %p787_p3 = pneg %p786_p2 }
  0x21   : > { %p794_p5 = pnand %p793_p4, %p787_p3 }
  0x23   : > { %797 = shalt.err (!%p794_p5)
}
  0x24   : > { %695 = dma.hbm_to_vmem [thread:$0]  (!%p998_p7), %s1166_s1, 128, %s168_s26, [#allocation5]  }
  0x25   : > { %s798_s21 = scalar_lea.hbm %s1167_s2, 128 }
  0x26   : > { %p799_p8 = scmp.ne.s32.totalorder %s1167_s2, %s798_s21  ;;  %p805_p5 = scmp.lt.u32.totalorder %s798_s21, %s1167_s2 }
  0x28   : > { %p801_p1 = pnand %p799_p8, %p772_p9 }
  0x2a   : > { %p802_p4 = pneg %p801_p1 }
  0x2c   : > { %p807_p10 = pnand %p805_p5, %p802_p4 }
  0x2e   : > { %810 = shalt.err (!%p807_p10)
}
  0x2f   : > { %s811_s26 = scalar_lea.vmem %s1002_s28, 128  ;;  %p819_p0 = scmp.lt.s32.totalorder %s1002_s28, %s1002_s28 }
  0x30   : > { %p812_p11 = scmp.ne.s32.totalorder %s1002_s28, %s811_s26  ;;  %p820_p2 = scmp.lt.s32.totalorder %s811_s26, %s811_s26 }
  0x32   : > { %p814_p12 = pnand %p812_p11, %p772_p9  ;;  %p821_p3 = por %p820_p2, %p819_p0 }
  0x34   : > { %p815_p13 = pneg %p814_p12 }
  0x36   : > { %p822_p6 = pnand %p821_p3, %p815_p13 }
  0x38   : > { %825 = shalt.err (!%p822_p6)
}
  0x39   : > { %698 = dma.hbm_to_vmem [thread:$0]  (!%p998_p7), %s1167_s2, 128, %s1002_s28, [#allocation5]  }
  0x3a   : > { %s30_s8 = sadd.s32 1, %s906_s19  ;;  %s39_s9 = sadd.s32 1, %s898_s17 }
  0x3b   : > { %p32_p9 = scmp.ge.s32.totalorder %s30_s8, 2  ;;  %p46_p8 = scmp.ne.s32.totalorder %s898_s17, %s894_s16 }
  0x3c   : > { %p47_p1 = scmp.eq.s32.totalorder %s910_s20, 0  ;;  %p705_p4 = scmp.lt.s32.totalorder %s910_s20, 2 }
  0x3d   : > { %s1188_s8 = smov (%p32_p9, %s30_s8), 0  ;;  %s192_s29 = sand.u32 1, %s898_s17  }
  0x3e   : > { %p48_p5 = por %p47_p1, %p46_p8  ;;  %s34_s10 = ssub.s32 %s906_s19, %s1188_s8 }
  0x3f   : > { %p37_p10 = scmp.eq.s32.totalorder %s34_s10, 0  ;;  %s646_s11 = sshll.u32 %s192_s29, 3 }
  0x40   : > { %s647_s12 = sshll.u32 %s906_s19, 7  ;;  %s196_s21 = scalar_lea.vmem [#allocation2], %s646_s11 }
  0x41   : > { %s1064_s13 = scalar_select %p37_p10, %s898_s17, %s39_s9  }
  0x42   : > { %s1069_s15 = scalar_lea.hbm %s1165_s0, %s647_s12  ;;  %s204_s25 = sshll.u32 %s196_s21, 4  ;;  %s1071_s25 = int_to_ptr.vmem [resolvable:$true] %s204_s25 }
  0x43   : > { %p1075_p7 = pnand %p705_p4, %p48_p5  ;;  %s193_s30 = scalar_lea.sflag [#allocation3], %s192_s29 }
  0x44   : > { %s826_s5 = scalar_lea.hbm %s1069_s15, 128  ;;  %s831_s7 = scalar_lea.hbm %s1165_s0, 256 }
  0x45   : > { %p827_p11 = scmp.ne.s32.totalorder %s1069_s15, %s826_s5  ;;  %p828_p12 = pneg %p1075_p7 }
  0x46   : > { %p832_p2 = scmp.lt.u32.totalorder %s1069_s15, %s1165_s0  ;;  %p833_p3 = scmp.lt.u32.totalorder %s831_s7, %s826_s5 }
  0x47   : > { %p829_p13 = pnand %p828_p12, %p827_p11  ;;  %p835_p9 = scmp.lt.u32.totalorder %s826_s5, %s1069_s15 }
  0x48   : > { %p834_p6 = por %p833_p3, %p832_p2 }
  0x49   : > { %p830_p0 = pneg %p829_p13 }
  0x4a   : > { %p836_p8 = por %p835_p9, %p834_p6 }
  0x4c   : > { %p837_p1 = pnand %p836_p8, %p830_p0 }
  0x4e   : > { %840 = shalt.err (!%p837_p1)
}
  0x4f   : > { %s841_s29 = scalar_lea.vmem %s1071_s25, 128  ;;  %s914_s11 = smov [#allocation2]  }
  0x50   : > { %p842_p4 = scmp.ne.s32.totalorder %s1071_s25, %s841_s29  ;;  %s846_s12 = sshll.u32 %s914_s11, 4  ;;  %s847_s12 = int_to_ptr.vmem [resolvable:$false] %s846_s12 }
  0x51   : > { %s848_s14 = scalar_lea.vmem %s847_s12, 256  ;;  %p849_p11 = scmp.lt.s32.totalorder %s1071_s25, %s847_s12 }
  0x52   : > { %p844_p5 = pnand %p842_p4, %p828_p12  ;;  %p850_p13 = scmp.lt.s32.totalorder %s848_s14, %s841_s29 }
  0x54   : > { %p845_p10 = pneg %p844_p5  ;;  %p851_p2 = por %p850_p13, %p849_p11 }
  0x56   : > { %p852_p3 = pnand %p851_p2, %p845_p10 }
  0x58   : > { %855 = shalt.err (!%p852_p3)
}
  0x59   : > { %702 = dma.hbm_to_vmem [thread:$0]  (!%p1075_p7), %s1069_s15, 128, %s1071_s25, %s193_s30  }
  0x5a   : > { %p1179_p0 = scmp.ne.s32.totalorder %s1176_s24, 0 }
  0x5b   : > { %s215_s28 = sand.u32 (!%p1179_p0), 1, %s894_s16   ;;  %p1180_p12 = scmp.ne.s32.totalorder (!%p1179_p0), %s1175_s23, 0 }
  0x5c   : > { %213 = sbr.rel (%p1179_p0) target bundleno = 411 (0x19b), region = 36  ;;  %s649_s21 = sshll.u32 (!%p1179_p0), %s215_s28, 3 }
  0x5d   : > { %s216_s5 = scalar_lea.sflag (!%p1179_p0), [#allocation3], %s215_s28  ;;  %s219_s26 = scalar_lea.vmem (!%p1179_p0), [#allocation2], %s649_s21 }
  0x63   : > { %881 = dma.done.wait (%p1180_p12), %s216_s5, 128  }
  0x64   : > { %883 = vsyncadd (%p1180_p12), %s216_s5, 4294967168  ;;  %p1181_p6 = scmp.ne.s32.totalorder %s1174_s22, 0 }
  0x66   : > { %885 = dma.done.wait (%p1181_p6), [#allocation5], 256  }
  0x67   : > { %887 = vsyncadd (%p1181_p6), [#allocation5], 4294967040  ;;  %v262_v0 = vlaneseq  ;;  %v915_v1 = vmov 0.0   ;;  %vm916_vm0 = vmmov 0   ;;  %v273_v3 = vld [vmem:[#allocation6] sm:$0xff]  ;;  %v272_v4 = vld [vmem:[#allocation4] sm:$0xff] }
  0x68   : > { %667 = vmatprep.subr.mxu1 %v915_v1  ;;  %672 = vmatprep.subr.mxu0 %v915_v1  ;;  %v261_v5 = vld [vmem:[%s219_s26] sm:$0xff]  ;;  %vm274_vm1 = vcmask 64512   ;;  %v655_v13 = vld [vmem:[%s1168_s3] ss:$0 sm:$0xff]  ;;  %v656_v17 = vld [vmem:[%s1168_s3 + $0x1] ss:$0 sm:$0xff] }
  0x69   : > { %669 = vmatprep.mubr.msk.f32.mxu1 %vm916_vm0, %v915_v1  ;;  %674 = vmatprep.mubr.msk.f32.mxu0 %vm916_vm0, %v915_v1  ;;  %v263_v2 = vshrl.u32 %v262_v0, 7  ;;  %v917_v30 = vmov 683565275   ;;  %v918_v32 = vmov 2475754826   ;;  %p254_p7 = scmp.lt.s32.totalorder %s902_s18, 1 }
  0x6a   : > { %668 = vmatpush3.msra.mxu1 %v273_v3  ;;  %673 = vmatpush3.msra.mxu0 %v272_v4  ;;  %v919_v35 = vmov 2131351028   ;;  %v920_v38 = vmov 2102212464   ;;  %v921_v41 = vmov 920167782  }
  0x6b   : > { %v267_v6 = vsub.s32 %v261_v5, %v263_v2  ;;  %v922_v44 = vmov 1326507024   ;;  %s1190_s18 = smov (!%p254_p7, %s902_s18), 1 }
  0x6c   : > { %s652_s25 = sshll.u32 %s1190_s18, 3 }
  0x6d   : > { %v270_v7 = vand.u32 255, %v267_v6  ;;  %v268_v8 = vshra.s32 %v267_v6, 8  ;;  %s260_s6 = scalar_lea.vmem %s1169_s4, %s652_s25 }
  0x6f   : > { %v271_v9 = vcvt.s32.f32 %v270_v7  ;;  %v269_v10 = vcvt.s32.f32 %v268_v8 }
  0x71   : > { %670 = vmatmul.mubr.msk.f32.vlgmr.msra.gmra.mrb[0].mxu1 %vm274_vm1, %v271_v9  ;;  %675 = vmatmul.mubr.msk.f32.vlgmr.msra.gmra.mrb[0].mxu0 %vm274_vm1, %v269_v10 }
 0x144   : > { %v344_v11 = vpop.f32.mrb[0].mxu1  ;;  %v417_v12 = vpop.f32.mrb[0].mxu0 }
 0x145   : > { %v418_v14 = vadd.f32 %v417_v12, %v344_v11  ;;  %v671_v15 = vpop.f32.mrb[1].mxu1  ;;  %v676_v16 = vpop.f32.mrb[1].mxu0 }
 0x147   : > { %v426_v18 = vmul.f32 %v655_v13, %v418_v14 }
 0x149   : > { %v1121_v19 = vsub.f32 %v426_v18, %v656_v17 }
 0x14b   : > { %v436_v20 = vand.u32 2139095040, %v1121_v19  ;;  %v433_v24 = vand.u32 2147483647, %v1121_v19  ;;  %vm435_vm9 = vcmp.lt.s32.totalorder %v1121_v19, 0  ;;  %vm525_vm14 = vweird.f32 %v1121_v19 }
 0x14d   : > { %v437_v21 = vshrl.u32 %v436_v20, 23  ;;  %v440_v27 = vand.u32 8388607, %v433_v24  ;;  %vm434_vm10 = vcmp.le.f32.partialorder %v433_v24, 0.7853982 }
 0x14f   : > { %v657_v22 = vadd.s32 4294967169, %v437_v21  ;;  %v441_v46 = vor.u32 8388608, %v440_v27 }
 0x151   : > { %v443_v23 = vadd.s32 1, %v657_v22  ;;  %v481_v60 = vshll.u32 %v441_v46, 8 }
 0x153   : > { %vm444_vm2 = vcmp.gt.s32.totalorder %v443_v23, 0 }
 0x154   : > { %v445_v25 = vsel %vm444_vm2, %v443_v23, 0 }
 0x155   : > { %v447_v26 = vand.u32 31, %v445_v25  ;;  %v446_v29 = vshrl.u32 %v445_v25, 5 }
 0x157   : > { %v448_v28 = vsub.s32 32, %v447_v26  ;;  %v450_v31 = vshll.u32 %v917_v30, %v447_v26  ;;  %v453_v33 = vshll.u32 %v918_v32, %v447_v26  ;;  %v456_v37 = vshll.u32 %v919_v35, %v447_v26 }
 0x158   : > { %v459_v40 = vshll.u32 %v920_v38, %v447_v26  ;;  %v462_v43 = vshll.u32 %v921_v41, %v447_v26  ;;  %vm465_vm3 = vcmp.lt.s32.totalorder %v446_v29, 1  ;;  %vm468_vm4 = vcmp.lt.s32.totalorder %v446_v29, 4 }
 0x159   : > { %v451_v34 = vshrl.u32 %v918_v32, %v448_v28  ;;  %v454_v36 = vshrl.u32 %v919_v35, %v448_v28  ;;  %v457_v39 = vshrl.u32 %v920_v38, %v448_v28  ;;  %v460_v42 = vshrl.u32 %v921_v41, %v448_v28 }
 0x15a   : > { %v463_v45 = vshrl.u32 %v922_v44, %v448_v28  ;;  %v449_v55 = vshrl.u32 %v917_v30, %v448_v28  ;;  %vm467_vm5 = vcmp.lt.s32.totalorder %v446_v29, 3  ;;  %vm466_vm6 = vcmp.lt.s32.totalorder %v446_v29, 2 }
 0x15b   : > { %v452_v47 = vor.u32 %v451_v34, %v450_v31  ;;  %v455_v48 = vor.u32 %v454_v36, %v453_v33  ;;  %v458_v49 = vor.u32 %v457_v39, %v456_v37  ;;  %v461_v50 = vor.u32 %v460_v42, %v459_v40 }
 0x15c   : > { %v464_v51 = vor.u32 %v463_v45, %v462_v43 }
 0x15d   : > { %v470_v52 = vsel %vm468_vm4, %v458_v49, 2102212464  ;;  %v473_v53 = vsel %vm465_vm3, %v452_v47, %v455_v48  ;;  %v477_v54 = vsel %vm465_vm3, %v455_v48, %v458_v49  ;;  %v474_v56 = vsel %vm468_vm4, %v461_v50, 920167782 }
 0x15e   : > { %v478_v57 = vsel %vm468_vm4, %v464_v51, 1326507024  ;;  %v475_v58 = vsel %vm467_vm5, %v458_v49, %v474_v56  ;;  %v469_v61 = vsel %vm465_vm3, %v449_v55, %v452_v47  ;;  %v471_v62 = vsel %vm467_vm5, %v455_v48, %v470_v52 }
 0x15f   : > { %v479_v59 = vsel %vm467_vm5, %v461_v50, %v478_v57  ;;  %v476_v63 = vsel %vm466_vm6, %v473_v53, %v475_v58  ;;  %v472_v5 = vsel %vm466_vm6, %v469_v61, %v471_v62 }
 0x160   : > { %v480_v0 = vsel %vm466_vm6, %v477_v54, %v479_v59  ;;  %v1130_v3 = vmul.u32.u64.low %v481_v60, %v476_v63  ;;  %v1131_v4 = vmul.u32.u64.high %v481_v60, %v476_v63, %v1130_v3  ;;  %v488_v7 = vmul.u32 %v481_v60, %v472_v5 }
 0x161   : > { %v1127_v1 = vmul.u32.u64.low %v481_v60, %v480_v0  ;;  %v1128_v2 = vmul.u32.u64.high %v481_v60, %v480_v0, %v1127_v1 }
 0x162   : > { %v491_v6 = vadd.s32 1, %v1131_v4 }
 0x163   : > { %vm490_vm7 = vc.u32 %v1128_v2, %v1130_v3  ;;  %v489_v20 = vadd.s32 %v1130_v3, %v1128_v2 }
 0x164   : > { %v492_v8 = vsel %vm490_vm7, %v491_v6, %v1131_v4 }
 0x165   : > { %v493_v9 = vadd.s32 %v492_v8, %v488_v7 }
 0x167   : > { %v494_v10 = vadd.s32 536870912, %v493_v9 }
 0x169   : > { %v495_v11 = vshrl.u32 %v494_v10, 30 }
 0x16b   : > { %v496_v12 = vshll.u32 %v495_v11, 30  ;;  %v519_v35 = vsub.s32 4, %v495_v11 }
 0x16d   : > { %v497_v13 = vsub.s32 %v493_v9, %v496_v12  ;;  %v520_v37 = vsel %vm435_vm9, %v519_v35, %v495_v11 }
 0x16e   : > { %v522_v38 = vsel %vm434_vm10, 0, %v520_v37 }
 0x16f   : > { %v499_v14 = vsub.s32 0, %v497_v13  ;;  %v526_v39 = vand.u32 3, %v522_v38 }
 0x171   : > { %v658_v15 = vmin.u32 %v499_v14, %v497_v13  ;;  %vm531_vm11 = vcmp.eq.s32.totalorder %v526_v39, 2  ;;  %vm528_vm12 = vcmp.eq.s32.totalorder %v526_v39, 0  ;;  %vm527_vm13 = vcmp.lt.s32.totalorder %v526_v39, 2 }
 0x173   : > { %v501_v16 = vclz %v658_v15 }
 0x175   : > { %v659_v17 = vadd.s32 4294967294, %v501_v16 }
 0x177   : > { %vm660_vm8 = vcmp.lt.s32.totalorder %v659_v17, 0 }
 0x178   : > { %v504_v18 = vsel %vm660_vm8, 0, %v659_v17 }
 0x179   : > { %v505_v21 = vsub.s32 32, %v504_v18  ;;  %v509_v22 = vsub.s32 4294967266, %v504_v18  ;;  %v506_v23 = vshll.u32 %v497_v13, %v504_v18 }
 0x17b   : > { %v507_v25 = vshrl.u32 %v489_v20, %v505_v21  ;;  %v510_v26 = vadd.s32 127, %v509_v22 }
 0x17d   : > { %v508_v27 = vor.u32 %v507_v25, %v506_v23  ;;  %v511_v28 = vshll.u32 %v510_v26, 23 }
 0x17f   : > { %v512_v29 = vor.u32 4788187, %v511_v28  ;;  %v515_v31 = vcvt.s32.f32 %v508_v27 }
 0x181   : > { %v513_v30 = vand.u32 2147483647, %v512_v29 }
 0x183   : > { %v516_v32 = vmul.f32 %v515_v31, %v513_v30 }
 0x185   : > { %v517_v33 = vxor.u32 2147483648, %v516_v32 }
 0x187   : > { %v518_v34 = vsel %vm435_vm9, %v517_v33, %v516_v32 }
 0x188   : > { %v521_v36 = vsel %vm434_vm10, %v1121_v19, %v518_v34 }
 0x189   : > { %766 = vcosq.f32 %v521_v36 }
 0x18a   : > { %768 = vsinq.f32 %v521_v36 }
 0x193   : > { %v767_v40 = vpop.eup %766 }
 0x194   : > { %v769_v41 = vpop.eup %768  ;;  %v532_v42 = vxor.u32 2147483648, %v767_v40 }
 0x195   : > { %v529_v43 = vxor.u32 2147483648, %v769_v41 }
 0x196   : > { %v533_v44 = vsel %vm531_vm11, %v532_v42, %v769_v41 }
 0x197   : > { %v530_v24 = vsel %vm528_vm12, %v767_v40, %v529_v43 }
 0x198   : > { %v534_v45 = vsel %vm527_vm13, %v530_v24, %v533_v44 }
 0x199   : > { %v535_v46 = vsel %vm525_vm14, nan, %v534_v45 }
 0x19a   : > { %536 = vst [vmem:[%s260_s6] sm:$0xff] %v535_v46 }
 0x19b PF: > { %s18_s20 = sadd.s32 1, %s910_s20   ;;  %s1182_s15 = smov %s894_s16 }
 0x19c   : > { %p15_p9 = scmp.ge.s32.totalorder %s18_s20, 4   ;;  %s1183_s16 = smov %s898_s17 }
 0x19d   : > { %s1184_s17 = smov %s1064_s13  ;;  %s1185_s18 = smov %s906_s19 }
 0x19e   : > { %s1186_s19 = smov %s1188_s8  ;;  %17 = sbr.rel (!%p15_p9) target bundleno = 5 (0x5), region = 84 }
 0x1a5   :  { %562 = vsyncpa [#allocation3], 1 }
 0x1a6   :  { %564 = vsyncpa [#allocation3 + $0x1], 1 }
 0x1a7   :  { %565 = vsyncpa [#allocation5], 1 }

</bundles_post_ra>
